<compile_context>
chip_gen: v6e
topology: v6e:2x2x1
jax: 0.10.0
libtpu: 0.0.40
codegen_flags: <defaults>
</compile_context>

<pallas_src>
import functools

import jax
import jax.numpy as jnp
from jax.experimental import pallas as pl
from jax.experimental.pallas import tpu as pltpu


def _set_function_kernel(x_ref, w1_ref, b1_ref, w2_ref, b2_ref,
                         w3p_ref, w3x_ref, b3_ref, w4_ref, b4_ref,
                         o_ref, *, S, M):
    """Single invocation: (S*M, d) bf16 slab -> (M, out_pad) f32, M = G*R_pad."""
    xb = x_ref[...]                                   # (S*M, d) bf16
    d = xb.shape[-1]

    # psi: Linear(d, 2d) -> ReLU -> Linear(2d, 2d) -> ReLU, one batched matmul
    # pair over all S*M rows; ReLU fused with the bf16 downcast.
    h1 = jnp.dot(xb, w1_ref[...],
                 preferred_element_type=jnp.float32) + b1_ref[...]
    h1b = jnp.maximum(h1, 0.0).astype(jnp.bfloat16)
    psi = jnp.dot(h1b, w2_ref[...],
                  preferred_element_type=jnp.float32) + b2_ref[...]
    psi = jnp.maximum(psi, 0.0)                       # (S*M, 2d) f32

    # Set-sum over S: leading-axis reshape (M % 8 == 0 so this is
    # layout-preserving) + tree reduction.  f32 accumulation.
    sum_psi = jnp.sum(psi.reshape(S, M, 2 * d), axis=0)                # (M, 2d)
    sum_x = jnp.sum(xb.reshape(S, M, d).astype(jnp.float32), axis=0)   # (M, d)

    # rho layer 1: split-w3 replaces concat([psi, x]) @ w3.
    h2 = (jnp.dot(sum_psi.astype(jnp.bfloat16), w3p_ref[...],
                  preferred_element_type=jnp.float32)
          + jnp.dot(sum_x.astype(jnp.bfloat16), w3x_ref[...],
                    preferred_element_type=jnp.float32)
          + b3_ref[...])
    h2b = jnp.maximum(h2, 0.0).astype(jnp.bfloat16)   # (M, 2d)

    # rho layer 2; w4/b4 were pre-scaled by 1/6, so relu6(z)/6 == clip(z,0,1).
    z = jnp.dot(h2b, w4_ref[...],
                preferred_element_type=jnp.float32) + b4_ref[...]
    o_ref[...] = jnp.clip(z, 0.0, 1.0).astype(o_ref.dtype)


def _prepare_params(params, lane=128):
    """Split w3, fold 1/6 into w4/b4, pad out_dim to a lane multiple, cast
    weights to bf16 (biases stay f32)."""
    w1, b1, w2, b2, w3, b3, w4, b4 = params
    d = w1.shape[0]
    w3_psi = w3[:2 * d, :]          # concat order is [psi | x]
    w3_x = w3[2 * d:, :]
    inv6 = jnp.float32(1.0 / 6.0)
    w4s = w4 * inv6                 # scale in f32, then cast
    b4s = b4 * inv6
    out_dim = w4.shape[1]
    out_pad = -(-out_dim // lane) * lane
    if out_pad != out_dim:          # lane-dense output stores
        w4s = jnp.pad(w4s, ((0, 0), (0, out_pad - out_dim)))
        b4s = jnp.pad(b4s, ((0, 0), (0, out_pad - out_dim)))
    bf = lambda w: w.astype(jnp.bfloat16)
    return (bf(w1), b1, bf(w2), b2, bf(w3_psi), bf(w3_x), b3, bf(w4s), b4s)


def _run_set_function(x2, prepared, S, M):
    """x2: (S*M, d) bf16. Returns (M, out_pad) float32. Single kernel call."""
    w1, b1, w2, b2, w3p, w3x, b3, w4s, b4s = prepared
    out_pad = w4s.shape[1]

    kernel = functools.partial(_set_function_kernel, S=S, M=M)
    vmem = pl.BlockSpec(memory_space=pltpu.MemorySpace.VMEM)
    return pl.pallas_call(
        kernel,
        out_shape=jax.ShapeDtypeStruct((M, out_pad), jnp.float32),
        in_specs=[vmem] * 10,
        out_specs=vmem,
        compiler_params=pltpu.CompilerParams(
            vmem_limit_bytes=32 * 1024 * 1024),
    )(x2, w1, b1, w2, b2, w3p, w3x, b3, w4s, b4s)


def set_function_forward(support_embeddings, prepared, level, train_way,
                         train_shot, resolution, output_dim):
    """support_embeddings: (num_support, resolution, input_dim) float32."""
    N, R, d = support_embeddings.shape
    assert R == resolution
    if level == "task":
        G, S = 1, N
    elif level == "class":
        assert N == train_way * train_shot
        G, S = train_way, train_shot
    else:
        raise ValueError(level)

    # Lay out as (S, G, R_pad, d): set axis leading so the in-kernel set-sum
    # is a leading-axis reduction; pad R so R_pad*G is sublane-aligned.
    x = support_embeddings.reshape(G, S, R, d)
    x = jnp.transpose(x, (1, 0, 2, 3))                    # (S, G, R, d)
    R_pad = -(-R // 8) * 8
    if R_pad != R:
        x = jnp.pad(x, ((0, 0), (0, 0), (0, R_pad - R), (0, 0)))
    M = G * R_pad
    x2 = x.reshape(S * M, d).astype(jnp.bfloat16)         # bf16 DMA

    out = _run_set_function(x2, prepared, S, M)           # (M, out_pad)
    return out.reshape(G, R_pad, -1)[:, :R, :output_dim]


def init_params(key, input_dim, output_dim):
    """Deterministic synthetic params.  Linear weights stored as (in, out)."""
    d = input_dim
    ks = jax.random.split(key, 8)
    scale = 0.1
    w1 = scale * jax.random.normal(ks[0], (d, 2 * d), jnp.float32)
    b1 = scale * jax.random.normal(ks[1], (1, 2 * d), jnp.float32)
    w2 = scale * jax.random.normal(ks[2], (2 * d, 2 * d), jnp.float32)
    b2 = scale * jax.random.normal(ks[3], (1, 2 * d), jnp.float32)
    w3 = scale * jax.random.normal(ks[4], (3 * d, 2 * d), jnp.float32)
    b3 = scale * jax.random.normal(ks[5], (1, 2 * d), jnp.float32)
    w4 = scale * jax.random.normal(ks[6], (2 * d, output_dim), jnp.float32)
    b4 = scale * jax.random.normal(ks[7], (1, output_dim), jnp.float32)
    return (w1, b1, w2, b2, w3, b3, w4, b4)


def _reference_forward(x, params, level, way, shot):
    """Pure f32 JAX reference matching the PyTorch module."""
    w1, b1, w2, b2, w3, b3, w4, b4 = params
    psi = jax.nn.relu(jax.nn.relu(x @ w1 + b1) @ w2 + b2)
    rho_in = jnp.concatenate([psi, x], axis=2)
    if level == "task":
        rho_in = jnp.sum(rho_in, axis=0, keepdims=True)
    else:
        N, R, c = rho_in.shape
        rho_in = jnp.sum(rho_in.reshape(way, shot, R, c), axis=1)
    h = jax.nn.relu(rho_in @ w3 + b3)
    out = h @ w4 + b4
    return jnp.clip(out, 0.0, 6.0) / 6.0


def _matched_reference(x, prepared, level, way, shot, output_dim):
    """JAX reference using the same bf16-operand / f32-accumulate recipe
    (including the bf16 rounding of x before sum_x)."""
    w1, b1, w2, b2, w3p, w3x, b3, w4s, b4s = prepared
    xb = x.astype(jnp.bfloat16)
    h1 = jnp.maximum(
        jnp.dot(xb, w1, preferred_element_type=jnp.float32) + b1, 0.0)
    psi = jnp.maximum(
        jnp.dot(h1.astype(jnp.bfloat16), w2,
                preferred_element_type=jnp.float32) + b2, 0.0)
    xf = xb.astype(jnp.float32)
    if level == "task":
        sum_psi = jnp.sum(psi, axis=0, keepdims=True)
        sum_x = jnp.sum(xf, axis=0, keepdims=True)
    else:
        N, R, c = psi.shape
        sum_psi = jnp.sum(psi.reshape(way, shot, R, c), axis=1)
        sum_x = jnp.sum(xf.reshape(way, shot, R, -1), axis=1)
    h2 = jnp.maximum(
        jnp.dot(sum_psi.astype(jnp.bfloat16), w3p,
                preferred_element_type=jnp.float32)
        + jnp.dot(sum_x.astype(jnp.bfloat16), w3x,
                  preferred_element_type=jnp.float32) + b3, 0.0)
    z = jnp.dot(h2.astype(jnp.bfloat16), w4s,
                preferred_element_type=jnp.float32) + b4s
    return jnp.clip(z, 0.0, 1.0)[..., :output_dim]


if __name__ == "__main__":
    train_way = 2
    train_shot = 3
    input_dim = 32
    output_dim = 32

    key = jax.random.PRNGKey(0)
    k_x, k_p = jax.random.split(key)
    params = init_params(k_p, input_dim, output_dim)
    prepared = _prepare_params(params)

    num_support = train_way * train_shot
    # resolution=8 is the aligned case; resolution=5 exercises the R % 8 != 0
    # padding path (FRN-style feature-map resolutions).
    for resolution in (8, 5):
        kk = jax.random.fold_in(k_x, resolution)
        support = jax.random.normal(
            kk, (num_support, resolution, input_dim), jnp.float32)

        for level in ("task", "class"):
            out = set_function_forward(support, prepared, level, train_way,
                                       train_shot, resolution, output_dim)
            out = jax.block_until_ready(out)
            G = 1 if level == "task" else train_way
            assert out.shape == (G, resolution, output_dim), (level, out.shape)

            # tight check vs. a bf16-matched reference (same arithmetic recipe)
            ref_bf16 = _matched_reference(support, prepared, level,
                                          train_way, train_shot, output_dim)
            assert jnp.allclose(out, ref_bf16, atol=2e-4, rtol=2e-3), level

            # loose check vs. the pure-f32 module semantics (bf16 operands)
            ref_f32 = _reference_forward(support, params, level,
                                         train_way, train_shot)
            assert jnp.allclose(out, ref_f32, atol=5e-2, rtol=5e-2), level

    print("KERNEL_OK")
</pallas_src>

<mosaic_0001>
module attributes {stable_mosaic.version = 11 : i64} {
  func.func @_set_function_kernel(%arg0: memref<48x32xbf16, #tpu.memory_space<vmem>>, %arg1: memref<32x64xbf16, #tpu.memory_space<vmem>>, %arg2: memref<1x64xf32, #tpu.memory_space<vmem>>, %arg3: memref<64x64xbf16, #tpu.memory_space<vmem>>, %arg4: memref<1x64xf32, #tpu.memory_space<vmem>>, %arg5: memref<64x64xbf16, #tpu.memory_space<vmem>>, %arg6: memref<32x64xbf16, #tpu.memory_space<vmem>>, %arg7: memref<1x64xf32, #tpu.memory_space<vmem>>, %arg8: memref<64x128xbf16, #tpu.memory_space<vmem>>, %arg9: memref<1x128xf32, #tpu.memory_space<vmem>>, %arg10: memref<8x128xf32, #tpu.memory_space<vmem>>) attributes {dimension_semantics = [], scalar_prefetch = 0 : i64, scratch_operands = 0 : i64, tpu.core_type = #tpu.core_type<tc>} {
    %c0 = arith.constant 0 : index
    %c0_0 = arith.constant 0 : index
    %0 = vector.load %arg0[%c0, %c0_0] : memref<48x32xbf16, #tpu.memory_space<vmem>>, vector<48x32xbf16>
    %c0_1 = arith.constant 0 : index
    %c0_2 = arith.constant 0 : index
    %1 = vector.load %arg1[%c0_1, %c0_2] : memref<32x64xbf16, #tpu.memory_space<vmem>>, vector<32x64xbf16>
    %cst = arith.constant dense<0.000000e+00> : vector<48x64xf32>
    %2 = tpu.matmul %0, %1, %cst {dimension_numbers = #tpu.dot_dimension_numbers<[1], [0], [0], [1], [0, 0, 1, 1], [], []>} : vector<48x32xbf16>, vector<32x64xbf16>, vector<48x64xf32> -> vector<48x64xf32>
    %c0_3 = arith.constant 0 : index
    %c0_4 = arith.constant 0 : index
    %3 = vector.load %arg2[%c0_3, %c0_4] : memref<1x64xf32, #tpu.memory_space<vmem>>, vector<1x64xf32>
    %4 = vector.broadcast %3 : vector<1x64xf32> to vector<48x64xf32>
    %5 = arith.addf %2, %4 : vector<48x64xf32>
    %cst_5 = arith.constant 0.000000e+00 : f32
    %6 = vector.broadcast %cst_5 : f32 to vector<48x64xf32>
    %7 = arith.maximumf %5, %6 : vector<48x64xf32>
    %8 = arith.truncf %7 : vector<48x64xf32> to vector<48x64xbf16>
    %c0_6 = arith.constant 0 : index
    %c0_7 = arith.constant 0 : index
    %9 = vector.load %arg3[%c0_6, %c0_7] : memref<64x64xbf16, #tpu.memory_space<vmem>>, vector<64x64xbf16>
    %cst_8 = arith.constant dense<0.000000e+00> : vector<48x64xf32>
    %10 = tpu.matmul %8, %9, %cst_8 {dimension_numbers = #tpu.dot_dimension_numbers<[1], [0], [0], [1], [0, 0, 1, 1], [], []>} : vector<48x64xbf16>, vector<64x64xbf16>, vector<48x64xf32> -> vector<48x64xf32>
    %c0_9 = arith.constant 0 : index
    %c0_10 = arith.constant 0 : index
    %11 = vector.load %arg4[%c0_9, %c0_10] : memref<1x64xf32, #tpu.memory_space<vmem>>, vector<1x64xf32>
    %12 = vector.broadcast %11 : vector<1x64xf32> to vector<48x64xf32>
    %13 = arith.addf %10, %12 : vector<48x64xf32>
    %cst_11 = arith.constant 0.000000e+00 : f32
    %14 = vector.broadcast %cst_11 : f32 to vector<48x64xf32>
    %15 = arith.maximumf %13, %14 : vector<48x64xf32>
    %16 = vector.shape_cast %15 : vector<48x64xf32> to vector<6x8x64xf32>
    %cst_12 = arith.constant dense<0.000000e+00> : vector<8x64xf32>
    %17 = vector.multi_reduction <add>, %16, %cst_12 [0] : vector<6x8x64xf32> to vector<8x64xf32>
    %18 = vector.shape_cast %0 : vector<48x32xbf16> to vector<6x8x32xbf16>
    %19 = arith.extf %18 : vector<6x8x32xbf16> to vector<6x8x32xf32>
    %cst_13 = arith.constant dense<0.000000e+00> : vector<8x32xf32>
    %20 = vector.multi_reduction <add>, %19, %cst_13 [0] : vector<6x8x32xf32> to vector<8x32xf32>
    %21 = arith.truncf %17 : vector<8x64xf32> to vector<8x64xbf16>
    %c0_14 = arith.constant 0 : index
    %c0_15 = arith.constant 0 : index
    %22 = vector.load %arg5[%c0_14, %c0_15] : memref<64x64xbf16, #tpu.memory_space<vmem>>, vector<64x64xbf16>
    %cst_16 = arith.constant dense<0.000000e+00> : vector<8x64xf32>
    %23 = tpu.matmul %21, %22, %cst_16 {dimension_numbers = #tpu.dot_dimension_numbers<[1], [0], [0], [1], [0, 0, 1, 1], [], []>} : vector<8x64xbf16>, vector<64x64xbf16>, vector<8x64xf32> -> vector<8x64xf32>
    %24 = arith.truncf %20 : vector<8x32xf32> to vector<8x32xbf16>
    %c0_17 = arith.constant 0 : index
    %c0_18 = arith.constant 0 : index
    %25 = vector.load %arg6[%c0_17, %c0_18] : memref<32x64xbf16, #tpu.memory_space<vmem>>, vector<32x64xbf16>
    %cst_19 = arith.constant dense<0.000000e+00> : vector<8x64xf32>
    %26 = tpu.matmul %24, %25, %cst_19 {dimension_numbers = #tpu.dot_dimension_numbers<[1], [0], [0], [1], [0, 0, 1, 1], [], []>} : vector<8x32xbf16>, vector<32x64xbf16>, vector<8x64xf32> -> vector<8x64xf32>
    %27 = arith.addf %23, %26 : vector<8x64xf32>
    %c0_20 = arith.constant 0 : index
    %c0_21 = arith.constant 0 : index
    %28 = vector.load %arg7[%c0_20, %c0_21] : memref<1x64xf32, #tpu.memory_space<vmem>>, vector<1x64xf32>
    %29 = vector.broadcast %28 : vector<1x64xf32> to vector<8x64xf32>
    %30 = arith.addf %27, %29 : vector<8x64xf32>
    %cst_22 = arith.constant 0.000000e+00 : f32
    %31 = vector.broadcast %cst_22 : f32 to vector<8x64xf32>
    %32 = arith.maximumf %30, %31 : vector<8x64xf32>
    %33 = arith.truncf %32 : vector<8x64xf32> to vector<8x64xbf16>
    %c0_23 = arith.constant 0 : index
    %c0_24 = arith.constant 0 : index
    %34 = vector.load %arg8[%c0_23, %c0_24] : memref<64x128xbf16, #tpu.memory_space<vmem>>, vector<64x128xbf16>
    %cst_25 = arith.constant dense<0.000000e+00> : vector<8x128xf32>
    %35 = tpu.matmul %33, %34, %cst_25 {dimension_numbers = #tpu.dot_dimension_numbers<[1], [0], [0], [1], [0, 0, 1, 1], [], []>} : vector<8x64xbf16>, vector<64x128xbf16>, vector<8x128xf32> -> vector<8x128xf32>
    %c0_26 = arith.constant 0 : index
    %c0_27 = arith.constant 0 : index
    %36 = vector.load %arg9[%c0_26, %c0_27] : memref<1x128xf32, #tpu.memory_space<vmem>>, vector<1x128xf32>
    %37 = vector.broadcast %36 : vector<1x128xf32> to vector<8x128xf32>
    %38 = arith.addf %35, %37 : vector<8x128xf32>
    %cst_28 = arith.constant 0.000000e+00 : f32
    %cst_29 = arith.constant 1.000000e+00 : f32
    %39 = vector.broadcast %cst_28 : f32 to vector<8x128xf32>
    %40 = arith.maximumf %39, %38 : vector<8x128xf32>
    %41 = vector.broadcast %cst_29 : f32 to vector<8x128xf32>
    %42 = arith.minimumf %41, %40 : vector<8x128xf32>
    %c0_30 = arith.constant 0 : index
    %c0_31 = arith.constant 0 : index
    %43 = vector.load %arg10[%c0_30, %c0_31] : memref<8x128xf32, #tpu.memory_space<vmem>>, vector<8x128xf32>
    tpu.vector_store %arg10[%c0_30, %c0_31], %42 {strides = array<i32>} : memref<8x128xf32, #tpu.memory_space<vmem>>, vector<8x128xf32>,
    return
  }
}

</mosaic_0001>

<bundles_post_ra>
// kernel: tpu_custom_call.1
= control target key start
LH: loop header
LB: loop body
LE: loop exit
PB: predicated region body
PF: predicated region fallthrough
CT: control target
= control target key end

     0   :  { %15 = vsyncpa [#allocation3], 0  ;;  %s1036_s0 = inlined_call_operand.vmem [shape: bf16[48,32], index: 0, kind: input, shape index: {}]   ;;  %s1037_s1 = inlined_call_operand.hbm [shape: bf16[32,64], index: 1, kind: input, shape index: {}]   ;;  %s1038_s2 = inlined_call_operand.vmem [shape: f32[1,64], index: 2, kind: input, shape index: {}]   ;;  %s1039_s3 = inlined_call_operand.vmem [shape: bf16[64,64], index: 3, kind: input, shape index: {}]   ;;  %s1040_s4 = inlined_call_operand.hbm [shape: f32[1,64], index: 4, kind: input, shape index: {}]   ;;  %s1041_s5 = inlined_call_operand.hbm [shape: bf16[64,64], index: 5, kind: input, shape index: {}]   ;;  %s1042_s6 = inlined_call_operand.vmem [shape: bf16[32,64], index: 6, kind: input, shape index: {}]   ;;  %s1043_s7 = inlined_call_operand.vmem [shape: f32[1,64], index: 7, kind: input, shape index: {}]   ;;  %s1044_s8 = inlined_call_operand.hbm [shape: bf16[64,128], index: 8, kind: input, shape index: {}]   ;;  %s1045_s9 = inlined_call_operand.vmem [shape: f32[1,128], index: 9, kind: input, shape index: {}]   ;;  %s1046_s10 = inlined_call_operand.hbm [shape: f32[8,128], index: 10, kind: output, shape index: {}]  }
   0x1   :  { %16 = vsyncpa [#allocation6], 0 }
   0x2   :  { %17 = vsyncpa [#allocation9], 0 }
   0x3   :  { %18 = vsyncpa [#allocation4], 0  ;;  %s862_s13 = smov [#allocation5]   ;;  %s863_s15 = smov [#allocation2]  }
   0x4   :  { %s43_s14 = sshll.u32 %s862_s13, 4  ;;  %s26_s16 = sshll.u32 %s863_s15, 4  ;;  %s44_s14 = int_to_ptr.vmem [resolvable:$true] %s43_s14  ;;  %s27_s16 = int_to_ptr.vmem [resolvable:$true] %s26_s16 }
   0x5   :  { %s762_s17 = scalar_lea.vmem %s44_s14, 16  ;;  %s766_s18 = scalar_lea.vmem %s44_s14, 32 }
   0x6   :  { %p763_p0 = scmp.ne.s32.totalorder %s44_s14, %s762_s17  ;;  %p767_p1 = scmp.lt.s32.totalorder %s44_s14, %s44_s14 }
   0x7   :  { %p768_p2 = scmp.lt.s32.totalorder %s766_s18, %s762_s17 }
   0x9   :  { %p769_p3 = por %p768_p2, %p767_p1 }
   0xb   :  { %p770_p4 = pnand %p769_p3, %p763_p0 }
   0xd   :  { %773 = shalt.err (!%p770_p4)
}
   0xe   :  { %46 = dma.hbm_to_vmem [thread:$0]  %s1040_s4, 16, %s44_s14, [#allocation6]  }
   0xf   :  { %s782_s21 = scalar_lea.vmem %s27_s16, 256  ;;  %p787_p6 = scmp.lt.s32.totalorder %s27_s16, %s27_s16 }
  0x10   :  { %p783_p5 = scmp.ne.s32.totalorder %s27_s16, %s782_s21  ;;  %p788_p7 = scmp.lt.s32.totalorder %s782_s21, %s782_s21 }
  0x12   :  { %p789_p8 = por %p788_p7, %p787_p6 }
  0x14   :  { %p790_p9 = pnand %p789_p8, %p783_p5 }
  0x16   :  { %793 = shalt.err (!%p790_p9)
}
  0x17   :  { %s864_s22 = smov 64   ;;  %s865_s23 = smov 4  }
  0x18   :  { %32 = dma.hbm_to_vmem [thread:$0]  %s1037_s1, 256, %s27_s16, [#allocation3], %s864_s22, %s864_s22, %s865_s23  }
  0x19   :  { %s866_s26 = smov [#allocation7]   ;;  %s867_s28 = smov [#allocation8]  }
  0x1a   :  { %s52_s27 = sshll.u32 %s866_s26, 4  ;;  %s68_s29 = sshll.u32 %s867_s28, 4  ;;  %s53_s27 = int_to_ptr.vmem [resolvable:$true] %s52_s27  ;;  %s69_s29 = int_to_ptr.vmem [resolvable:$true] %s68_s29 }
  0x1b   :  { %s802_s4 = scalar_lea.vmem %s53_s27, 512  ;;  %p807_p11 = scmp.lt.s32.totalorder %s53_s27, %s53_s27 }
  0x1c   :  { %p803_p10 = scmp.ne.s32.totalorder %s53_s27, %s802_s4  ;;  %p808_p12 = scmp.lt.s32.totalorder %s802_s4, %s802_s4 }
  0x1e   :  { %p809_p13 = por %p808_p12, %p807_p11 }
  0x20   :  { %p810_p0 = pnand %p809_p13, %p803_p10 }
  0x22   :  { %813 = shalt.err (!%p810_p0)
}
  0x23   :  { %58 = dma.hbm_to_vmem [thread:$0]  %s1041_s5, 512, %s53_s27, [#allocation6], %s864_s22, %s864_s22, %s865_s23  }
  0x24   :  { %s822_s12 = scalar_lea.vmem %s69_s29, 512  ;;  %p827_p2 = scmp.lt.s32.totalorder %s69_s29, %s69_s29 }
  0x25   :  { %p823_p1 = scmp.ne.s32.totalorder %s69_s29, %s822_s12  ;;  %p828_p3 = scmp.lt.s32.totalorder %s822_s12, %s822_s12 }
  0x27   :  { %p829_p4 = por %p828_p3, %p827_p2 }
  0x29   :  { %p830_p5 = pnand %p829_p4, %p823_p1 }
  0x2b   :  { %833 = shalt.err (!%p830_p5)
}
  0x2c   :  { %74 = dma.hbm_to_vmem [thread:$0]  %s1044_s8, 512, %s69_s29, [#allocation9], %s864_s22, %s864_s22, %s865_s23  }
  0x2d   :  { %854 = dma.done.wait [#allocation3], 256  }
  0x2e   :  { %855 = vsyncadd [#allocation3], 4294967040 }
  0x2f   :  { %856 = dma.done.wait [#allocation6], 528  }
  0x30   :  { %857 = vsyncadd [#allocation6], 4294966768 }
  0x31   :  { %858 = dma.done.wait [#allocation9], 512  }
  0x32   :  { %859 = vsyncadd [#allocation9], 4294966784  ;;  %v868_v0 = vmov 0.0   ;;  %vm869_vm0 = vmmov 0   ;;  %v732_v1 = vld [vmem:[#allocation2 + $0x8] sm:$0xff]   ;;  %v733_v2 = vld [vmem:[#allocation2] sm:$0xff]  }
  0x33   :  { %655 = vmatprep.subr.bf16.mxu0 %v868_v0  ;;  %659 = vmatprep.mubr.msk.bf16.mxu0 %vm869_vm0, %v868_v0  ;;  %v90_v3 = vld [vmem:[%s1036_s0] sm:$0xff]   ;;  %v92_v4 = vld [vmem:[%s1036_s0 + $0x8] sm:$0xff]   ;;  %v94_v5 = vld [vmem:[%s1036_s0 + $0x10] sm:$0xff]   ;;  %vm134_vm1 = vcmask 261120   ;;  %vm249_vm2 = vcmask 523264   ;;  %s870_s11 = smov [#allocation10]  }
  0x34   :  { %671 = vmatprep.subr.bf16.mxu1 %v868_v0  ;;  %679 = vmatprep.mubr.msk.bf16.mxu1 %vm869_vm0, %v868_v0  ;;  %v333_v6 = vunpack.c.l.bf16 %v90_v3  ;;  %v334_v7 = vunpack.c.h.bf16 %v90_v3  ;;  %v737_v8 = vld [vmem:[%s1039_s3 + $0x18] sm:$0xff]   ;;  %v335_v9 = vunpack.c.l.bf16 %v92_v4  ;;  %v336_v10 = vunpack.c.h.bf16 %v92_v4  ;;  %v738_v24 = vld [vmem:[%s1039_s3 + $0x10] sm:$0xff]   ;;  %v739_v25 = vld [vmem:[%s1039_s3 + $0x8] sm:$0xff]   ;;  %s587_s12 = sshll.u32 %s870_s11, 4  ;;  %s588_s12 = int_to_ptr.vmem [resolvable:$true] %s587_s12 }
  0x35   :  { %656 = vmatpush3.bf16.msra.mxu0 %v732_v1  ;;  %v337_v11 = vunpack.c.l.bf16 %v94_v5  ;;  %v338_v14 = vunpack.c.h.bf16 %v94_v5  ;;  %672 = vmatpush3.bf16.msra.mxu1 %v737_v8  ;;  %v740_v26 = vld [vmem:[%s1039_s3] sm:$0xff]   ;;  %v741_v55 = vld [vmem:[%s1042_s6 + $0x8] sm:$0xff]   ;;  %v746_v61 = vld [vmem:[#allocation7] sm:$0xff]   ;;  %p839_p7 = scmp.lt.s32.totalorder %s588_s12, %s588_s12 }
  0x36   :  { %657 = vmatprep.subr.bf16.mxu0 %v868_v0  ;;  %v339_v12 = vsel %vm134_vm1, %v333_v6, 0.0  ;;  %v340_v13 = vsel %vm134_vm1, %v334_v7, 0.0  ;;  %v342_v16 = vsel %vm134_vm1, %v335_v9, 0.0  ;;  %v344_v17 = vsel %vm134_vm1, %v336_v10, 0.0  ;;  %673 = vmatprep.subr.bf16.mxu1 %v868_v0  ;;  %v598_v27 = vld [vmem:[%s1038_s2] ss:$0 sm:$0xff] }
  0x37   :  { %v341_v15 = vadd.f32 %v340_v13, %v339_v12  ;;  %v346_v18 = vsel %vm134_vm1, %v337_v11, 0.0  ;;  %v348_v19 = vsel %vm134_vm1, %v338_v14, 0.0  ;;  %v742_v56 = vld [vmem:[#allocation7 + $0x18] sm:$0xff]   ;;  %v743_v57 = vld [vmem:[#allocation7 + $0x10] sm:$0xff]   ;;  %v745_v60 = vld [vmem:[#allocation7 + $0x8] sm:$0xff]  }
  0x38   :  { %v744_v58 = vld [vmem:[%s1042_s6] sm:$0xff]   ;;  %v747_v62 = vld [vmem:[#allocation8 + $0x18] sm:$0xff]  }
  0x39   :  { %658 = vmatpush3.bf16.msra.mxu0 %v733_v2  ;;  %v343_v20 = vadd.f32 %v342_v16, %v341_v15  ;;  %674 = vmatpush3.bf16.msra.mxu1 %v738_v24  ;;  %v748_v63 = vld [vmem:[#allocation8 + $0x10] sm:$0xff]  }
  0x3a   :  { %691 = vmatprep.subr.bf16.mxu0 %v868_v0  ;;  %675 = vmatprep.subr.bf16.mxu1 %v868_v0 }
  0x3b   :  { %v345_v21 = vadd.f32 %v344_v17, %v343_v20 }
  0x3c   :  { %660 = vmatmul.mubr.msk.bf16.vlgmr.msra.gmra.mxu0 %vm134_vm1, %v90_v3 }
  0x3d   :  { %663 = vmatprep.mubr.msk.bf16.mxu0 %vm869_vm0, %v868_v0  ;;  %v347_v22 = vadd.f32 %v346_v18, %v345_v21  ;;  %676 = vmatpush3.bf16.msra.mxu1 %v739_v25 }
  0x3e   :  { %677 = vmatprep.subr.bf16.mxu1 %v868_v0  ;;  %692 = vmatpush3.bf16.msra.mxu0 %v741_v55 }
  0x3f   :  { %v968_v23 = vadd.f32 %v348_v19, %v347_v22  ;;  %693 = vmatprep.subr.bf16.mxu0 %v868_v0 }
  0x41   :  { %678 = vmatpush3.bf16.msra.mxu1 %v740_v26  ;;  %v359_v59 = vpack.c.bf16 %v968_v23, %v968_v23 }
  0x42   :  { %699 = vmatprep.subr.bf16.mxu1 %v868_v0  ;;  %694 = vmatpush3.bf16.msra.mxu0 %v744_v58 }
  0x43   :  { %711 = vmatprep.subr.bf16.mxu0 %v868_v0 }
  0x44   :  { %664 = vmatmul.mubr.msk.bf16.gmra.mxu0 %vm134_vm1, %v92_v4  ;;  %v607_v4 = vld [vmem:[#allocation5] ss:$0 sm:$0xff] }
  0x45   :  { %667 = vmatprep.mubr.msk.bf16.mxu0 %vm869_vm0, %v868_v0 }
  0x4c   :  { %668 = vmatmul.mubr.msk.bf16.gmra.mxu0 %vm134_vm1, %v94_v5 }
  0x4d   :  { %695 = vmatprep.mubr.msk.bf16.mxu0 %vm869_vm0, %v868_v0 }
  0x54   :  { %696 = vmatmul.mubr.msk.bf16.vlgmr.msra.gmra.mxu0 %vm134_vm1, %v359_v59 }
  0x55   :  { %719 = vmatprep.mubr.msk.bf16.mxu0 %vm869_vm0, %v868_v0  ;;  %712 = vmatpush3.bf16.msra.mxu0 %v747_v62 }
  0x56   :  { %713 = vmatprep.subr.bf16.mxu0 %v868_v0 }
  0x59   :  { %714 = vmatpush3.bf16.msra.mxu0 %v748_v63 }
  0x5a   :  { %715 = vmatprep.subr.bf16.mxu0 %v868_v0 }
  0xfc   :  { %v178_v28 = vpop.f32.mrf.mxu0 }
  0xfd   :  { %v179_v30 = vadd.f32 %v598_v27, %v178_v28 }
  0xfe   :  { %v661_v29 = vpop.f32.mrf.mxu0 }
  0xff   :  { %v201_v34 = vmax.f32 %v179_v30, 0.0 }
 0x100   :  { %v181_v31 = vpop.f32.mrf.mxu0 }
 0x101   :  { %v182_v32 = vadd.f32 %v598_v27, %v181_v31 }
 0x102   :  { %v662_v33 = vpop.f32.mrf.mxu0 }
 0x103   :  { %v202_v35 = vmax.f32 %v182_v32, 0.0 }
 0x104   :  { %v186_v36 = vpop.f32.mrf.mxu0 }
 0x105   :  { %v207_v37 = vpack.c.bf16 %v202_v35, %v201_v34  ;;  %v187_v39 = vadd.f32 %v598_v27, %v186_v36 }
 0x106   :  { %v665_v38 = vpop.f32.mrf.mxu0 }
 0x107   :  { %680 = vmatmul.mubr.msk.bf16.vlgmr.msra.gmra.mxu1 %vm249_vm2, %v207_v37  ;;  %v203_v43 = vmax.f32 %v187_v39, 0.0 }
 0x108   :  { %v189_v40 = vpop.f32.mrf.mxu0  ;;  %683 = vmatprep.mubr.msk.bf16.mxu1 %vm869_vm0, %v868_v0  ;;  %700 = vmatpush3.bf16.msra.mxu1 %v742_v56 }
 0x109   :  { %v190_v41 = vadd.f32 %v598_v27, %v189_v40  ;;  %701 = vmatprep.subr.bf16.mxu1 %v868_v0 }
 0x10a   :  { %v666_v42 = vpop.f32.mrf.mxu0 }
 0x10b   :  { %v204_v44 = vmax.f32 %v190_v41, 0.0  ;;  %v749_v42 = vld [vmem:[#allocation8 + $0x8] sm:$0xff]  }
 0x10c   :  { %v194_v45 = vpop.f32.mrf.mxu0  ;;  %702 = vmatpush3.bf16.msra.mxu1 %v743_v57  ;;  %716 = vmatpush3.bf16.msra.mxu0 %v749_v42 }
 0x10d   :  { %v208_v46 = vpack.c.bf16 %v204_v44, %v203_v43  ;;  %v195_v48 = vadd.f32 %v598_v27, %v194_v45  ;;  %703 = vmatprep.subr.bf16.mxu1 %v868_v0  ;;  %717 = vmatprep.subr.bf16.mxu0 %v868_v0  ;;  %v750_v43 = vld [vmem:[#allocation8] sm:$0xff]   ;;  %v623_v45 = vld [vmem:[%s1043_s7] ss:$0 sm:$0xff]  ;;  %s834_s7 = scalar_lea.vmem %s588_s12, 128 }
 0x10e   :  { %v669_v47 = vpop.f32.mrf.mxu0  ;;  %p835_p6 = scmp.ne.s32.totalorder %s588_s12, %s834_s7  ;;  %p840_p8 = scmp.lt.s32.totalorder %s834_s7, %s834_s7 }
 0x10f   :  { %684 = vmatmul.mubr.msk.bf16.gmra.mxu1 %vm249_vm2, %v208_v46  ;;  %v205_v52 = vmax.f32 %v195_v48, 0.0 }
 0x110   :  { %v197_v49 = vpop.f32.mrf.mxu0  ;;  %687 = vmatprep.mubr.msk.bf16.mxu1 %vm869_vm0, %v868_v0  ;;  %704 = vmatpush3.bf16.msra.mxu1 %v745_v60  ;;  %p841_p9 = por %p840_p8, %p839_p7 }
 0x111   :  { %v198_v50 = vadd.f32 %v598_v27, %v197_v49  ;;  %705 = vmatprep.subr.bf16.mxu1 %v868_v0  ;;  %718 = vmatpush3.bf16.msra.mxu0 %v750_v43 }
 0x112   :  { %v670_v51 = vpop.f32.mrf.mxu0  ;;  %p842_p10 = pnand %p841_p9, %p835_p6 }
 0x113   :  { %v206_v53 = vmax.f32 %v198_v50, 0.0 }
 0x114   :  { %706 = vmatpush3.bf16.msra.mxu1 %v746_v61  ;;  %v413_v38 = vpop.f32.mrf.mxu0 }
 0x115   :  { %v209_v54 = vpack.c.bf16 %v206_v53, %v205_v52 }
 0x116   :  { %v697_v39 = vpop.f32.mrf.mxu0 }
 0x117   :  { %688 = vmatmul.mubr.msk.bf16.gmra.mxu1 %vm249_vm2, %v209_v54 }
 0x118   :  { %707 = vmatprep.mubr.msk.bf16.mxu1 %vm869_vm0, %v868_v0  ;;  %v416_v40 = vpop.f32.mrf.mxu0  ;;  %v624_v0 = vld [vmem:[%s1045_s9] ss:$0 sm:$0xff] }
 0x11a   :  { %v698_v41 = vpop.f32.mrf.mxu0 }
 0x1c7   :  { %v293_v1 = vpop.f32.mrf.mxu1 }
 0x1c8   :  { %v294_v8 = vadd.f32 %v607_v4, %v293_v1 }
 0x1c9   :  { %v681_v2 = vpop.f32.mrf.mxu1 }
 0x1ca   :  { %v316_v13 = vmax.f32 %v294_v8, 0.0 }
 0x1cb   :  { %v296_v3 = vpop.f32.mrf.mxu1 }
 0x1cc   :  { %v297_v6 = vadd.f32 %v607_v4, %v296_v3  ;;  %v322_v20 = vsel %vm249_vm2, %v316_v13, 0.0 }
 0x1cd   :  { %v682_v5 = vpop.f32.mrf.mxu1 }
 0x1ce   :  { %v317_v11 = vmax.f32 %v297_v6, 0.0 }
 0x1cf   :  { %v301_v7 = vpop.f32.mrf.mxu1 }
 0x1d0   :  { %v302_v9 = vadd.f32 %v607_v4, %v301_v7  ;;  %v323_v17 = vsel %vm249_vm2, %v317_v11, 0.0 }
 0x1d1   :  { %v685_v10 = vpop.f32.mrf.mxu1  ;;  %v324_v23 = vadd.f32 %v323_v17, %v322_v20 }
 0x1d2   :  { %v318_v14 = vmax.f32 %v302_v9, 0.0 }
 0x1d3   :  { %v304_v12 = vpop.f32.mrf.mxu1 }
 0x1d4   :  { %v305_v15 = vadd.f32 %v607_v4, %v304_v12  ;;  %v325_v21 = vsel %vm249_vm2, %v318_v14, 0.0 }
 0x1d5   :  { %v686_v16 = vpop.f32.mrf.mxu1  ;;  %v326_v27 = vadd.f32 %v325_v21, %v324_v23 }
 0x1d6   :  { %v319_v18 = vmax.f32 %v305_v15, 0.0 }
 0x1d7   :  { %v309_v19 = vpop.f32.mrf.mxu1 }
 0x1d8   :  { %v310_v22 = vadd.f32 %v607_v4, %v309_v19  ;;  %v327_v25 = vsel %vm249_vm2, %v319_v18, 0.0 }
 0x1d9   :  { %v689_v24 = vpop.f32.mrf.mxu1  ;;  %v328_v31 = vadd.f32 %v327_v25, %v326_v27 }
 0x1da   :  { %v320_v26 = vmax.f32 %v310_v22, 0.0 }
 0x1db   :  { %v312_v28 = vpop.f32.mrf.mxu1 }
 0x1dc   :  { %v329_v29 = vsel %vm249_vm2, %v320_v26, 0.0  ;;  %v313_v30 = vadd.f32 %v607_v4, %v312_v28 }
 0x1dd   :  { %v690_v32 = vpop.f32.mrf.mxu1  ;;  %v330_v34 = vadd.f32 %v329_v29, %v328_v31 }
 0x1de   :  { %v321_v33 = vmax.f32 %v313_v30, 0.0 }
 0x1e0   :  { %v331_v35 = vsel %vm249_vm2, %v321_v33, 0.0 }
 0x1e1   :  { %v332_v36 = vadd.f32 %v331_v35, %v330_v34 }
 0x1e3   :  { %v350_v37 = vpack.c.bf16 %v332_v36, %v332_v36 }
 0x1e5   :  { %708 = vmatmul.mubr.msk.bf16.vlgmr.msra.gmra.mxu1 %vm249_vm2, %v350_v37 }
 0x2a5   :  { %v480_v44 = vpop.f32.mrf.mxu1 }
 0x2a6   :  { %v481_v46 = vadd.f32 %v480_v44, %v413_v38 }
 0x2a7   :  { %v709_v47 = vpop.f32.mrf.mxu1 }
 0x2a8   :  { %v493_v48 = vadd.f32 %v623_v45, %v481_v46 }
 0x2a9   :  { %v483_v49 = vpop.f32.mrf.mxu1 }
 0x2aa   :  { %v494_v50 = vmax.f32 %v493_v48, 0.0 }
 0x2ab   :  { %v710_v51 = vpop.f32.mrf.mxu1 }
 0x2ac   :  { %v495_v52 = vpack.c.bf16 %v494_v50, %v494_v50 }
 0x2ae   :  { %720 = vmatmul.mubr.msk.bf16.vlgmr.msra.gmra.mxu0 %vm249_vm2, %v495_v52 }
 0x36e   :  { %v572_v53 = vpop.f32.mrf.mxu0 }
 0x36f   :  { %v573_v54 = vadd.f32 %v624_v0, %v572_v53 }
 0x370   :  { %v721_v55 = vpop.f32.mrf.mxu0 }
 0x371   :  { %v578_v56 = vmax.f32 %v573_v54, 0.0 }
 0x372   :  { %v575_v57 = vpop.f32.mrf.mxu0 }
 0x373   :  { %v579_v58 = vmin.f32 %v578_v56, 1.0 }
 0x374   :  { %v722_v59 = vpop.f32.mrf.mxu0 }
 0x375   :  { %580 = vst [vmem:[#allocation10] sm:$0xff] %v579_v58 }
 0x376   :  { %845 = shalt.err (!%p842_p10)
}
 0x377   :  { %590 = dma.vmem_to_hbm [thread:$0]  %s588_s12, 128, %s1046_s10, [#allocation4]  }
 0x378   :  { %860 = dma.done.wait [#allocation4], 128  }
 0x379   :  { %861 = vsyncadd [#allocation4], 4294967168 }
 0x37a   :  { %594 = vsyncpa [#allocation3], 1 }
 0x37b   :  { %595 = vsyncpa [#allocation6], 1 }
 0x37c   :  { %596 = vsyncpa [#allocation9], 1 }
 0x37d   :  { %597 = vsyncpa [#allocation4], 1 }

</bundles_post_ra>
